<compile_context>
chip_gen: v6e
topology: v6e:2x2x1
jax: 0.10.0
libtpu: 0.0.40
codegen_flags: <defaults>
</compile_context>

<pallas_src>
import functools
import numpy as np
import jax
import jax.numpy as jnp
from jax.experimental import pallas as pl
from jax.experimental.pallas import tpu as pltpu


@functools.lru_cache(maxsize=None)
def _dft2_matrix(H, W):
    """Flattened 2-D DFT matrix D2 = kron(W_H, W_W) (symmetric), complex64."""
    jh = np.arange(H)
    jw = np.arange(W)
    wh = np.exp(-2j * np.pi * np.outer(jh, jh) / H)   # (H, H), symmetric
    ww = np.exp(-2j * np.pi * np.outer(jw, jw) / W)   # (W, W), symmetric
    d2 = np.kron(wh, ww).astype(np.complex64)         # (H*W, H*W), symmetric
    # TODO(synk): switch to separable per-axis DFT matmuls (or K-tile D2)
    # before H*W exceeds ~1024 — the flattened D2/Md/Mz matrices are
    # O((HW)^2) and would blow v7x's 64 MiB VMEM well before v5e/v6e's 128 MiB.
    return jnp.asarray(d2)


def _iter_kernel(x_ref, m_ref, out_ref):
    # Single stacked MXU matmul: (NB, 2*HW) @ (2*HW, HW) -> (NB, HW).
    out_ref[...] = jnp.dot(x_ref[...], m_ref[...],
                           preferred_element_type=jnp.float32)


@jax.jit
def _iteration_step_impl(z, dirty, fpsf, alpha):
    B, C, H, W = z.shape
    N = B * C
    HW = H * W

    d2 = _dft2_matrix(H, W)                              # (HW, HW) complex64
    f = fpsf.reshape(HW).astype(jnp.complex64)
    alpha = alpha.astype(jnp.float32)
    # TODO(synk): add a tiny epsilon here if alpha can be ~0 and fpsf has
    # spectral nulls (same failure mode as the PyTorch reference).
    den = f.real * f.real + f.imag * f.imag + alpha      # (HW,) real
    wnum = jnp.conj(f) / den                             # conj(fpsf)/den (complex)
    anum = alpha / den                                   # alpha/den (real)

    # Fold filter + inverse DFT + 1/(H*W) scale into two real HWxHW matrices.
    hp = jax.lax.Precision.HIGHEST
    d2c = jnp.conj(d2)
    md = jnp.real(jnp.matmul(d2 * wnum[None, :], d2c, precision=hp)) / HW
    mz = jnp.real(jnp.matmul(d2 * anum[None, :], d2c, precision=hp)) / HW
    m = jnp.concatenate([md, mz], axis=0).astype(jnp.float32)    # (2*HW, HW)

    dflat = dirty.reshape(N, HW).astype(jnp.float32)
    zflat = z.reshape(N, HW).astype(jnp.float32)
    x_in = jnp.concatenate([dflat, zflat], axis=1)                # (N, 2*HW)

    # Adaptive grid: only split across cores when each core gets >=128 rows.
    G = 2 if N >= 256 else 1
    NB = max(8, pl.cdiv(N, 8 * G) * 8)                   # rows per step, mult of 8
    Npad = NB * G
    if Npad != N:
        x_in = jnp.pad(x_in, ((0, Npad - N), (0, 0)))

    # NOTE: the constant-index matrix spec could be single-buffered
    # (pipeline_mode=pl.Buffered(1)) to halve its VMEM footprint; neutral at
    # 16x16 so the default double-buffering is kept here for robustness.
    out = pl.pallas_call(
        _iter_kernel,
        out_shape=jax.ShapeDtypeStruct((Npad, HW), jnp.float32),
        grid=(G,),
        in_specs=[pl.BlockSpec((NB, 2 * HW), lambda g: (g, 0)),
                  pl.BlockSpec((2 * HW, HW), lambda g: (0, 0))],
        out_specs=pl.BlockSpec((NB, HW), lambda g: (g, 0)),
        compiler_params=pltpu.CompilerParams(
            dimension_semantics=("parallel",)),
    )(x_in, m)

    return out[:N].reshape(B, C, H, W)


def iteration_step(z, dirty, fpsf, alpha):
    """z, dirty: (B, C, H, W) real; fpsf: (H, W) complex64; alpha: scalar."""
    # alpha goes in as a traced 0-d array so changing it does not retrace.
    return _iteration_step_impl(z, dirty, fpsf, jnp.asarray(alpha, jnp.float32))


if __name__ == "__main__":
    B, C, H, W = 2, 4, 16, 16
    key = jax.random.PRNGKey(0)
    kz, kd, kp = jax.random.split(key, 3)

    z = jax.random.normal(kz, (B, C, H, W), dtype=jnp.float32)
    dirty = jax.random.normal(kd, (B, C, H, W), dtype=jnp.float32)
    # Deterministic synthetic PSF -> its 2-D FFT is the (complex) fpsf input.
    psf = jax.random.normal(kp, (H, W), dtype=jnp.float32) * 0.1
    psf = psf.at[H // 2, W // 2].add(1.0)
    fpsf = jnp.fft.fft2(psf).astype(jnp.complex64)
    alpha = 0.05

    x = iteration_step(z, dirty, fpsf, alpha)
    x = jax.block_until_ready(x)

    # Pure-JAX reference (same math as the PyTorch module).
    num = jnp.conj(fpsf)[None, None] * jnp.fft.fft2(dirty) + alpha * jnp.fft.fft2(z)
    den = (jnp.conj(fpsf) * fpsf).real[None, None] + alpha
    x_ref = jnp.fft.ifft2(num / den).real

    assert x.shape == (B, C, H, W)
    assert jnp.allclose(x, x_ref, rtol=1e-3, atol=1e-3), "mismatch vs reference"
    print("KERNEL_OK")
</pallas_src>

<mosaic_0001>
module attributes {stable_mosaic.version = 11 : i64} {
  func.func @_iter_kernel(%arg0: i32, %arg1: memref<8x512xf32, #tpu.memory_space<vmem>>, %arg2: memref<512x256xf32, #tpu.memory_space<vmem>>, %arg3: memref<8x256xf32, #tpu.memory_space<vmem>>) attributes {dimension_semantics = [#tpu.dimension_semantics<parallel>], iteration_bounds = array<i64: 1>, scalar_prefetch = 0 : i64, scratch_operands = 0 : i64, tpu.core_type = #tpu.core_type<tc>, window_params = [{transform_indices = @transform_0, window_bounds = array<i64: 8, 512>}, {pipeline_mode = #tpu.pipeline_mode<synchronous>, transform_indices = @transform_1, window_bounds = array<i64: 512, 256>}, {transform_indices = @transform_2, window_bounds = array<i64: 8, 256>}]} {
    %c0 = arith.constant 0 : index
    %c0_0 = arith.constant 0 : index
    %0 = vector.load %arg1[%c0, %c0_0] : memref<8x512xf32, #tpu.memory_space<vmem>>, vector<8x512xf32>
    %c0_1 = arith.constant 0 : index
    %c0_2 = arith.constant 0 : index
    %1 = vector.load %arg2[%c0_1, %c0_2] : memref<512x256xf32, #tpu.memory_space<vmem>>, vector<512x256xf32>
    %cst = arith.constant dense<0.000000e+00> : vector<8x256xf32>
    %2 = tpu.matmul %0, %1, %cst {dimension_numbers = #tpu.dot_dimension_numbers<[1], [0], [0], [1], [0, 0, 1, 1], [], []>} : vector<8x512xf32>, vector<512x256xf32>, vector<8x256xf32> -> vector<8x256xf32>
    %c0_3 = arith.constant 0 : index
    %c0_4 = arith.constant 0 : index
    %3 = vector.load %arg3[%c0_3, %c0_4] : memref<8x256xf32, #tpu.memory_space<vmem>>, vector<8x256xf32>
    tpu.vector_store %arg3[%c0_3, %c0_4], %2 {strides = array<i32>} : memref<8x256xf32, #tpu.memory_space<vmem>>, vector<8x256xf32>,
    return
  }
  func.func @transform_0(%arg0: i32) -> (i32, i32) {
    %c0_i32 = arith.constant 0 : i32
    %c0_i32_0 = arith.constant 0 : i32
    return %arg0, %c0_i32 : i32, i32
  }
  func.func @transform_1(%arg0: i32) -> (i32, i32) {
    %c0_i32 = arith.constant 0 : i32
    %c0_i32_0 = arith.constant 0 : i32
    %c0_i32_1 = arith.constant 0 : i32
    return %c0_i32, %c0_i32_0 : i32, i32
  }
  func.func @transform_2(%arg0: i32) -> (i32, i32) {
    %c0_i32 = arith.constant 0 : i32
    %c0_i32_0 = arith.constant 0 : i32
    return %arg0, %c0_i32 : i32, i32
  }
}

</mosaic_0001>

<bundles_post_ra>
// kernel: custom-call
= control target key start
LH: loop header
LB: loop body
LE: loop exit
PB: predicated region body
PF: predicated region fallthrough
CT: control target
= control target key end

     0   :  { %2 = vsyncpa [#allocation0], 0  ;;  %s47_s0 = inlined_call_operand.hbm [shape: c64[16,16], index: 0, kind: input, shape index: {}]   ;;  %s48_s1 = inlined_call_operand.vmem [shape: f32[16,16], index: 1, kind: output, shape index: {}]  }
   0x1   :  { %s3_s8 = sshll.u32 %s48_s1, 4  ;;  %s4_s8 = int_to_ptr.vmem [resolvable:$true] %s3_s8 }
   0x2   :  { %s17_s9 = scalar_lea.vmem %s4_s8, 256  ;;  %p22_p1 = scmp.lt.s32.totalorder %s4_s8, %s4_s8 }
   0x3   :  { %p18_p0 = scmp.ne.s32.totalorder %s4_s8, %s17_s9  ;;  %p23_p2 = scmp.lt.s32.totalorder %s17_s9, %s17_s9 }
   0x5   :  { %p24_p3 = por %p23_p2, %p22_p1 }
   0x7   :  { %p25_p4 = pnand %p24_p3, %p18_p0 }
   0x9   :  { %28 = shalt.err (!%p25_p4)  }
   0xa   :  { %6 = dma.hbm_to_vmem [thread:$0]  %s47_s0, 256, %s4_s8, [#allocation0] }
   0xb   :  { %29 = dma.done.wait [#allocation0], 256  }
   0xc   :  { %30 = vsyncadd [#allocation0], 4294967040 }
   0xd   :  { %8 = vsyncpa [#allocation0], 1 }

// kernel: custom-call.1
= control target key start
LH: loop header
LB: loop body
LE: loop exit
PB: predicated region body
PF: predicated region fallthrough
CT: control target
= control target key end

     0   :  { %s51_s0 = inlined_call_operand.hbm [shape: c64[16,16], index: 0, kind: input, shape index: {}]   ;;  %s52_s1 = inlined_call_operand.vmem [shape: f32[16,16], index: 1, kind: output, shape index: {}]  }
   0x1   :  { %s2_s8 = scalar_lea.hbm %s51_s0, 256 }
   0x2   :  { %3 = vsyncpa [#allocation0], 0  ;;  %s4_s11 = sshll.u32 %s52_s1, 4  ;;  %s5_s11 = int_to_ptr.vmem [resolvable:$true] %s4_s11 }
   0x3   :  { %s20_s12 = scalar_lea.vmem %s5_s11, 256  ;;  %p25_p1 = scmp.lt.s32.totalorder %s5_s11, %s5_s11 }
   0x4   :  { %p21_p0 = scmp.ne.s32.totalorder %s5_s11, %s20_s12  ;;  %p26_p2 = scmp.lt.s32.totalorder %s20_s12, %s20_s12 }
   0x6   :  { %p27_p3 = por %p26_p2, %p25_p1 }
   0x8   :  { %p28_p4 = pnand %p27_p3, %p21_p0 }
   0xa   :  { %31 = shalt.err (!%p28_p4)  }
   0xb   :  { %7 = dma.hbm_to_vmem [thread:$0]  %s2_s8, 256, %s5_s11, [#allocation0] }
   0xc   :  { %33 = dma.done.wait [#allocation0], 256  }
   0xd   :  { %34 = vsyncadd [#allocation0], 4294967040 }
   0xe   :  { %9 = vsyncpa [#allocation0], 1 }

// kernel: _iteration_step_impl.1
= control target key start
LH: loop header
LB: loop body
LE: loop exit
PB: predicated region body
PF: predicated region fallthrough
CT: control target
= control target key end

     0   :  { %s708_s1 = inlined_call_operand.vmem [shape: f32[512,256], index: 1, kind: input, shape index: {}]   ;;  %s709_s0 = inlined_call_operand.vmem [shape: f32[8,512], index: 0, kind: input, shape index: {}]   ;;  %s710_s2 = inlined_call_operand.vmem [shape: f32[8,256], index: 2, kind: output, shape index: {}]  }
   0x1   :  { %v46_v0 = vld [vmem:[%s708_s1 + $0xf8] sm:$0xff]  ;;  %v45_v2 = vld [vmem:[%s708_s1 + $0xf0] sm:$0xff]  ;;  %v44_v4 = vld [vmem:[%s708_s1 + $0xe8] sm:$0xff] }
   0x2   :  { %v110_v1 = vld [vmem:[%s708_s1 + $0x2f8] sm:$0xff]  ;;  %143 = vmatprep.subr.mxu0 %v46_v0  ;;  %v109_v3 = vld [vmem:[%s708_s1 + $0x2f0] sm:$0xff]  ;;  %v108_v5 = vld [vmem:[%s708_s1 + $0x2e8] sm:$0xff] }
   0x3   :  { %214 = vmatprep.subr.mxu1 %v110_v1  ;;  %144 = vmatpush1.msra.mxu0 %v45_v2  ;;  %v43_v6 = vld [vmem:[%s708_s1 + $0xe0] sm:$0xff]  ;;  %v42_v8 = vld [vmem:[%s708_s1 + $0xd8] sm:$0xff]  ;;  %v41_v10 = vld [vmem:[%s708_s1 + $0xd0] sm:$0xff] }
   0x4   :  { %215 = vmatpush1.msra.mxu1 %v109_v3  ;;  %v107_v7 = vld [vmem:[%s708_s1 + $0x2e0] sm:$0xff]  ;;  %145 = vmatprep.subr.mxu0 %v44_v4  ;;  %v106_v9 = vld [vmem:[%s708_s1 + $0x2d8] sm:$0xff]  ;;  %v105_v11 = vld [vmem:[%s708_s1 + $0x2d0] sm:$0xff] }
   0x5   :  { %216 = vmatprep.subr.mxu1 %v108_v5  ;;  %146 = vmatpush1.msra.mxu0 %v43_v6  ;;  %v40_v12 = vld [vmem:[%s708_s1 + $0xc8] sm:$0xff]  ;;  %v39_v14 = vld [vmem:[%s708_s1 + $0xc0] sm:$0xff]  ;;  %v38_v16 = vld [vmem:[%s708_s1 + $0xb8] sm:$0xff] }
   0x6   :  { %217 = vmatpush1.msra.mxu1 %v107_v7  ;;  %v104_v13 = vld [vmem:[%s708_s1 + $0x2c8] sm:$0xff]  ;;  %147 = vmatprep.subr.mxu0 %v42_v8  ;;  %v103_v15 = vld [vmem:[%s708_s1 + $0x2c0] sm:$0xff]  ;;  %v102_v17 = vld [vmem:[%s708_s1 + $0x2b8] sm:$0xff] }
   0x7   :  { %218 = vmatprep.subr.mxu1 %v106_v9  ;;  %148 = vmatpush1.msra.mxu0 %v41_v10  ;;  %v37_v18 = vld [vmem:[%s708_s1 + $0xb0] sm:$0xff]  ;;  %v36_v20 = vld [vmem:[%s708_s1 + $0xa8] sm:$0xff]  ;;  %v35_v22 = vld [vmem:[%s708_s1 + $0xa0] sm:$0xff] }
   0x8   :  { %219 = vmatpush1.msra.mxu1 %v105_v11  ;;  %149 = vmatprep.subr.mxu0 %v40_v12  ;;  %v101_v19 = vld [vmem:[%s708_s1 + $0x2b0] sm:$0xff]  ;;  %v100_v21 = vld [vmem:[%s708_s1 + $0x2a8] sm:$0xff]  ;;  %v99_v23 = vld [vmem:[%s708_s1 + $0x2a0] sm:$0xff] }
   0x9   :  { %220 = vmatprep.subr.mxu1 %v104_v13  ;;  %150 = vmatpush1.msra.mxu0 %v39_v14  ;;  %v34_v24 = vld [vmem:[%s708_s1 + $0x98] sm:$0xff]  ;;  %v33_v26 = vld [vmem:[%s708_s1 + $0x90] sm:$0xff]  ;;  %v32_v28 = vld [vmem:[%s708_s1 + $0x88] sm:$0xff] }
   0xa   :  { %221 = vmatpush1.msra.mxu1 %v103_v15  ;;  %151 = vmatprep.subr.mxu0 %v38_v16  ;;  %v98_v25 = vld [vmem:[%s708_s1 + $0x298] sm:$0xff]  ;;  %v97_v27 = vld [vmem:[%s708_s1 + $0x290] sm:$0xff]  ;;  %v96_v29 = vld [vmem:[%s708_s1 + $0x288] sm:$0xff] }
   0xb   :  { %222 = vmatprep.subr.mxu1 %v102_v17  ;;  %152 = vmatpush1.msra.mxu0 %v37_v18  ;;  %v31_v30 = vld [vmem:[%s708_s1 + $0x80] sm:$0xff]  ;;  %v30_v32 = vld [vmem:[%s708_s1 + $0x78] sm:$0xff]  ;;  %v29_v34 = vld [vmem:[%s708_s1 + $0x70] sm:$0xff] }
   0xc   :  { %223 = vmatpush1.msra.mxu1 %v101_v19  ;;  %153 = vmatprep.subr.mxu0 %v36_v20  ;;  %v95_v31 = vld [vmem:[%s708_s1 + $0x280] sm:$0xff]  ;;  %v94_v33 = vld [vmem:[%s708_s1 + $0x278] sm:$0xff]  ;;  %v93_v35 = vld [vmem:[%s708_s1 + $0x270] sm:$0xff] }
   0xd   :  { %224 = vmatprep.subr.mxu1 %v100_v21  ;;  %154 = vmatpush1.msra.mxu0 %v35_v22  ;;  %v28_v36 = vld [vmem:[%s708_s1 + $0x68] sm:$0xff]  ;;  %v27_v38 = vld [vmem:[%s708_s1 + $0x60] sm:$0xff]  ;;  %v26_v40 = vld [vmem:[%s708_s1 + $0x58] sm:$0xff] }
   0xe   :  { %225 = vmatpush1.msra.mxu1 %v99_v23  ;;  %155 = vmatprep.subr.mxu0 %v34_v24  ;;  %v92_v37 = vld [vmem:[%s708_s1 + $0x268] sm:$0xff]  ;;  %v91_v39 = vld [vmem:[%s708_s1 + $0x260] sm:$0xff]  ;;  %v90_v41 = vld [vmem:[%s708_s1 + $0x258] sm:$0xff] }
   0xf   :  { %226 = vmatprep.subr.mxu1 %v98_v25  ;;  %156 = vmatpush1.msra.mxu0 %v33_v26  ;;  %v25_v42 = vld [vmem:[%s708_s1 + $0x50] sm:$0xff]  ;;  %v24_v44 = vld [vmem:[%s708_s1 + $0x48] sm:$0xff]  ;;  %v23_v46 = vld [vmem:[%s708_s1 + $0x40] sm:$0xff] }
  0x10   :  { %227 = vmatpush1.msra.mxu1 %v97_v27  ;;  %157 = vmatprep.subr.mxu0 %v32_v28  ;;  %v89_v43 = vld [vmem:[%s708_s1 + $0x250] sm:$0xff]  ;;  %v88_v45 = vld [vmem:[%s708_s1 + $0x248] sm:$0xff]  ;;  %v87_v47 = vld [vmem:[%s708_s1 + $0x240] sm:$0xff] }
  0x11   :  { %228 = vmatprep.subr.mxu1 %v96_v29  ;;  %158 = vmatpush1.msra.mxu0 %v31_v30  ;;  %v22_v48 = vld [vmem:[%s708_s1 + $0x38] sm:$0xff]  ;;  %v21_v50 = vld [vmem:[%s708_s1 + $0x30] sm:$0xff]  ;;  %v20_v52 = vld [vmem:[%s708_s1 + $0x28] sm:$0xff] }
  0x12   :  { %229 = vmatpush1.msra.mxu1 %v95_v31  ;;  %159 = vmatprep.subr.mxu0 %v30_v32  ;;  %v86_v49 = vld [vmem:[%s708_s1 + $0x238] sm:$0xff]  ;;  %v85_v51 = vld [vmem:[%s708_s1 + $0x230] sm:$0xff]  ;;  %v84_v53 = vld [vmem:[%s708_s1 + $0x228] sm:$0xff] }
  0x13   :  { %230 = vmatprep.subr.mxu1 %v94_v33  ;;  %160 = vmatpush1.msra.mxu0 %v29_v34  ;;  %v19_v54 = vld [vmem:[%s708_s1 + $0x20] sm:$0xff]  ;;  %v18_v56 = vld [vmem:[%s708_s1 + $0x18] sm:$0xff]  ;;  %v17_v58 = vld [vmem:[%s708_s1 + $0x10] sm:$0xff] }
  0x14   :  { %231 = vmatpush1.msra.mxu1 %v93_v35  ;;  %161 = vmatprep.subr.mxu0 %v28_v36  ;;  %v83_v55 = vld [vmem:[%s708_s1 + $0x220] sm:$0xff]  ;;  %v82_v57 = vld [vmem:[%s708_s1 + $0x218] sm:$0xff]  ;;  %v81_v59 = vld [vmem:[%s708_s1 + $0x210] sm:$0xff] }
  0x15   :  { %232 = vmatprep.subr.mxu1 %v92_v37  ;;  %162 = vmatpush1.msra.mxu0 %v27_v38  ;;  %v16_v60 = vld [vmem:[%s708_s1 + $0x8] sm:$0xff]  ;;  %v15_v62 = vld [vmem:[%s708_s1] sm:$0xff]  ;;  %v78_v0 = vld [vmem:[%s708_s1 + $0x1f8] sm:$0xff] }
  0x16   :  { %233 = vmatpush1.msra.mxu1 %v91_v39  ;;  %163 = vmatprep.subr.mxu0 %v26_v40  ;;  %v80_v61 = vld [vmem:[%s708_s1 + $0x208] sm:$0xff]  ;;  %v79_v63 = vld [vmem:[%s708_s1 + $0x200] sm:$0xff]  ;;  %v142_v1 = vld [vmem:[%s708_s1 + $0x3f8] sm:$0xff] }
  0x17   :  { %234 = vmatprep.subr.mxu1 %v90_v41  ;;  %164 = vmatpush1.msra.mxu0 %v25_v42  ;;  %v77_v2 = vld [vmem:[%s708_s1 + $0x1f0] sm:$0xff]  ;;  %v76_v4 = vld [vmem:[%s708_s1 + $0x1e8] sm:$0xff]  ;;  %v75_v6 = vld [vmem:[%s708_s1 + $0x1e0] sm:$0xff] }
  0x18   :  { %235 = vmatpush1.msra.mxu1 %v89_v43  ;;  %165 = vmatprep.subr.mxu0 %v24_v44  ;;  %v141_v3 = vld [vmem:[%s708_s1 + $0x3f0] sm:$0xff]  ;;  %v140_v5 = vld [vmem:[%s708_s1 + $0x3e8] sm:$0xff]  ;;  %v139_v7 = vld [vmem:[%s708_s1 + $0x3e0] sm:$0xff] }
  0x19   :  { %236 = vmatprep.subr.mxu1 %v88_v45  ;;  %166 = vmatpush1.msra.mxu0 %v23_v46  ;;  %v74_v8 = vld [vmem:[%s708_s1 + $0x1d8] sm:$0xff]  ;;  %v73_v10 = vld [vmem:[%s708_s1 + $0x1d0] sm:$0xff]  ;;  %v72_v12 = vld [vmem:[%s708_s1 + $0x1c8] sm:$0xff] }
  0x1a   :  { %237 = vmatpush1.msra.mxu1 %v87_v47  ;;  %167 = vmatprep.subr.mxu0 %v22_v48  ;;  %v138_v9 = vld [vmem:[%s708_s1 + $0x3d8] sm:$0xff]  ;;  %v137_v11 = vld [vmem:[%s708_s1 + $0x3d0] sm:$0xff]  ;;  %v136_v13 = vld [vmem:[%s708_s1 + $0x3c8] sm:$0xff] }
  0x1b   :  { %238 = vmatprep.subr.mxu1 %v86_v49  ;;  %168 = vmatpush1.msra.mxu0 %v21_v50  ;;  %v71_v14 = vld [vmem:[%s708_s1 + $0x1c0] sm:$0xff]  ;;  %v70_v16 = vld [vmem:[%s708_s1 + $0x1b8] sm:$0xff]  ;;  %v69_v18 = vld [vmem:[%s708_s1 + $0x1b0] sm:$0xff] }
  0x1c   :  { %239 = vmatpush1.msra.mxu1 %v85_v51  ;;  %169 = vmatprep.subr.mxu0 %v20_v52  ;;  %v135_v15 = vld [vmem:[%s708_s1 + $0x3c0] sm:$0xff]  ;;  %v134_v17 = vld [vmem:[%s708_s1 + $0x3b8] sm:$0xff]  ;;  %v133_v19 = vld [vmem:[%s708_s1 + $0x3b0] sm:$0xff] }
  0x1d   :  { %240 = vmatprep.subr.mxu1 %v84_v53  ;;  %170 = vmatpush1.msra.mxu0 %v19_v54  ;;  %v68_v20 = vld [vmem:[%s708_s1 + $0x1a8] sm:$0xff]  ;;  %v67_v22 = vld [vmem:[%s708_s1 + $0x1a0] sm:$0xff]  ;;  %v66_v24 = vld [vmem:[%s708_s1 + $0x198] sm:$0xff] }
  0x1e   :  { %241 = vmatpush1.msra.mxu1 %v83_v55  ;;  %171 = vmatprep.subr.mxu0 %v18_v56  ;;  %v132_v21 = vld [vmem:[%s708_s1 + $0x3a8] sm:$0xff]  ;;  %v131_v23 = vld [vmem:[%s708_s1 + $0x3a0] sm:$0xff]  ;;  %v130_v25 = vld [vmem:[%s708_s1 + $0x398] sm:$0xff] }
  0x1f   :  { %242 = vmatprep.subr.mxu1 %v82_v57  ;;  %172 = vmatpush1.msra.mxu0 %v17_v58  ;;  %v65_v26 = vld [vmem:[%s708_s1 + $0x190] sm:$0xff]  ;;  %v64_v28 = vld [vmem:[%s708_s1 + $0x188] sm:$0xff]  ;;  %v63_v30 = vld [vmem:[%s708_s1 + $0x180] sm:$0xff] }
  0x20   :  { %243 = vmatpush1.msra.mxu1 %v81_v59  ;;  %173 = vmatprep.subr.mxu0 %v16_v60  ;;  %v129_v27 = vld [vmem:[%s708_s1 + $0x390] sm:$0xff]  ;;  %v128_v29 = vld [vmem:[%s708_s1 + $0x388] sm:$0xff]  ;;  %v127_v31 = vld [vmem:[%s708_s1 + $0x380] sm:$0xff] }
  0x21   :  { %244 = vmatprep.subr.mxu1 %v80_v61  ;;  %174 = vmatpush1.msra.mxu0 %v15_v62  ;;  %v62_v32 = vld [vmem:[%s708_s1 + $0x178] sm:$0xff]  ;;  %v61_v34 = vld [vmem:[%s708_s1 + $0x170] sm:$0xff]  ;;  %v60_v36 = vld [vmem:[%s708_s1 + $0x168] sm:$0xff] }
  0x22   :  { %245 = vmatpush1.msra.mxu1 %v79_v63  ;;  %175 = vmatprep.subr.mxu0 %v78_v0  ;;  %v126_v33 = vld [vmem:[%s708_s1 + $0x378] sm:$0xff]  ;;  %v125_v35 = vld [vmem:[%s708_s1 + $0x370] sm:$0xff]  ;;  %v124_v37 = vld [vmem:[%s708_s1 + $0x368] sm:$0xff] }
  0x23   :  { %246 = vmatprep.subr.mxu1 %v142_v1  ;;  %176 = vmatpush2.msra.mxu0 %v77_v2  ;;  %v59_v38 = vld [vmem:[%s708_s1 + $0x160] sm:$0xff]  ;;  %v58_v40 = vld [vmem:[%s708_s1 + $0x158] sm:$0xff]  ;;  %v57_v42 = vld [vmem:[%s708_s1 + $0x150] sm:$0xff] }
  0x24   :  { %247 = vmatpush2.msra.mxu1 %v141_v3  ;;  %177 = vmatprep.subr.mxu0 %v76_v4  ;;  %v123_v39 = vld [vmem:[%s708_s1 + $0x360] sm:$0xff]  ;;  %v122_v41 = vld [vmem:[%s708_s1 + $0x358] sm:$0xff]  ;;  %v121_v43 = vld [vmem:[%s708_s1 + $0x350] sm:$0xff] }
  0x25   :  { %248 = vmatprep.subr.mxu1 %v140_v5  ;;  %178 = vmatpush2.msra.mxu0 %v75_v6  ;;  %v56_v44 = vld [vmem:[%s708_s1 + $0x148] sm:$0xff]  ;;  %v55_v46 = vld [vmem:[%s708_s1 + $0x140] sm:$0xff]  ;;  %v54_v48 = vld [vmem:[%s708_s1 + $0x138] sm:$0xff] }
  0x26   :  { %249 = vmatpush2.msra.mxu1 %v139_v7  ;;  %179 = vmatprep.subr.mxu0 %v74_v8  ;;  %v120_v45 = vld [vmem:[%s708_s1 + $0x348] sm:$0xff]  ;;  %v119_v47 = vld [vmem:[%s708_s1 + $0x340] sm:$0xff]  ;;  %v118_v49 = vld [vmem:[%s708_s1 + $0x338] sm:$0xff] }
  0x27   :  { %250 = vmatprep.subr.mxu1 %v138_v9  ;;  %180 = vmatpush2.msra.mxu0 %v73_v10  ;;  %v53_v50 = vld [vmem:[%s708_s1 + $0x130] sm:$0xff]  ;;  %v52_v52 = vld [vmem:[%s708_s1 + $0x128] sm:$0xff]  ;;  %v51_v54 = vld [vmem:[%s708_s1 + $0x120] sm:$0xff] }
  0x28   :  { %251 = vmatpush2.msra.mxu1 %v137_v11  ;;  %181 = vmatprep.subr.mxu0 %v72_v12  ;;  %v117_v51 = vld [vmem:[%s708_s1 + $0x330] sm:$0xff]  ;;  %v116_v53 = vld [vmem:[%s708_s1 + $0x328] sm:$0xff]  ;;  %v115_v55 = vld [vmem:[%s708_s1 + $0x320] sm:$0xff] }
  0x29   :  { %252 = vmatprep.subr.mxu1 %v136_v13  ;;  %182 = vmatpush2.msra.mxu0 %v71_v14  ;;  %v50_v56 = vld [vmem:[%s708_s1 + $0x118] sm:$0xff]  ;;  %v49_v58 = vld [vmem:[%s708_s1 + $0x110] sm:$0xff]  ;;  %v48_v60 = vld [vmem:[%s708_s1 + $0x108] sm:$0xff] }
  0x2a   :  { %253 = vmatpush2.msra.mxu1 %v135_v15  ;;  %183 = vmatprep.subr.mxu0 %v70_v16  ;;  %v114_v57 = vld [vmem:[%s708_s1 + $0x318] sm:$0xff]  ;;  %v113_v59 = vld [vmem:[%s708_s1 + $0x310] sm:$0xff]  ;;  %v112_v61 = vld [vmem:[%s708_s1 + $0x308] sm:$0xff] }
  0x2b   :  { %254 = vmatprep.subr.mxu1 %v134_v17  ;;  %184 = vmatpush2.msra.mxu0 %v69_v18  ;;  %v47_v62 = vld [vmem:[%s708_s1 + $0x100] sm:$0xff]  ;;  %v12_v63 = vld [vmem:[%s709_s0 + $0x8] sm:$0xff]  ;;  %v14_v1 = vld [vmem:[%s709_s0 + $0x18] sm:$0xff] }
  0x2c   :  { %255 = vmatpush2.msra.mxu1 %v133_v19  ;;  %185 = vmatprep.subr.mxu0 %v68_v20  ;;  %v111_v0 = vld [vmem:[%s708_s1 + $0x300] sm:$0xff]  ;;  %v13_v3 = vld [vmem:[%s709_s0 + $0x10] sm:$0xff] }
  0x2d   :  { %256 = vmatprep.subr.mxu1 %v132_v21  ;;  %186 = vmatpush2.msra.mxu0 %v67_v22  ;;  %v11_v2 = vld [vmem:[%s709_s0] sm:$0xff] }
  0x2e   :  { %257 = vmatpush2.msra.mxu1 %v131_v23  ;;  %187 = vmatprep.subr.mxu0 %v66_v24 }
  0x2f   :  { %258 = vmatprep.subr.mxu1 %v130_v25  ;;  %188 = vmatpush2.msra.mxu0 %v65_v26 }
  0x30   :  { %259 = vmatpush2.msra.mxu1 %v129_v27  ;;  %189 = vmatprep.subr.mxu0 %v64_v28 }
  0x31   :  { %260 = vmatprep.subr.mxu1 %v128_v29  ;;  %190 = vmatpush2.msra.mxu0 %v63_v30 }
  0x32   :  { %261 = vmatpush2.msra.mxu1 %v127_v31  ;;  %191 = vmatprep.subr.mxu0 %v62_v32 }
  0x33   :  { %262 = vmatprep.subr.mxu1 %v126_v33  ;;  %192 = vmatpush2.msra.mxu0 %v61_v34 }
  0x34   :  { %263 = vmatpush2.msra.mxu1 %v125_v35  ;;  %193 = vmatprep.subr.mxu0 %v60_v36 }
  0x35   :  { %264 = vmatprep.subr.mxu1 %v124_v37  ;;  %194 = vmatpush2.msra.mxu0 %v59_v38 }
  0x36   :  { %265 = vmatpush2.msra.mxu1 %v123_v39  ;;  %195 = vmatprep.subr.mxu0 %v58_v40 }
  0x37   :  { %266 = vmatprep.subr.mxu1 %v122_v41  ;;  %196 = vmatpush2.msra.mxu0 %v57_v42 }
  0x38   :  { %267 = vmatpush2.msra.mxu1 %v121_v43  ;;  %197 = vmatprep.subr.mxu0 %v56_v44 }
  0x39   :  { %268 = vmatprep.subr.mxu1 %v120_v45  ;;  %198 = vmatpush2.msra.mxu0 %v55_v46 }
  0x3a   :  { %269 = vmatpush2.msra.mxu1 %v119_v47  ;;  %199 = vmatprep.subr.mxu0 %v54_v48 }
  0x3b   :  { %270 = vmatprep.subr.mxu1 %v118_v49  ;;  %200 = vmatpush2.msra.mxu0 %v53_v50 }
  0x3c   :  { %271 = vmatpush2.msra.mxu1 %v117_v51  ;;  %201 = vmatprep.subr.mxu0 %v52_v52 }
  0x3d   :  { %272 = vmatprep.subr.mxu1 %v116_v53  ;;  %202 = vmatpush2.msra.mxu0 %v51_v54 }
  0x3e   :  { %273 = vmatpush2.msra.mxu1 %v115_v55  ;;  %203 = vmatprep.subr.mxu0 %v50_v56 }
  0x3f   :  { %274 = vmatprep.subr.mxu1 %v114_v57  ;;  %204 = vmatpush2.msra.mxu0 %v49_v58 }
  0x40   :  { %275 = vmatpush2.msra.mxu1 %v113_v59  ;;  %205 = vmatprep.subr.mxu0 %v48_v60 }
  0x41   :  { %276 = vmatprep.subr.mxu1 %v112_v61  ;;  %206 = vmatpush2.msra.mxu0 %v47_v62 }
  0x42   :  { %207 = vmatprep.mubr.f32.mxu0 %v12_v63  ;;  %277 = vmatpush2.msra.mxu1 %v111_v0 }
  0x43   :  { %278 = vmatprep.mubr.f32.mxu1 %v14_v1  ;;  %208 = vmatmul.mubr.f32.vlgmr.msra.gmra.mxu0 %v11_v2 }
  0x44   :  { %279 = vmatmul.mubr.f32.vlgmr.msra.gmra.mxu1 %v13_v3 }
 0x103   :  { %v209_v4 = vpop.f32.mrf.mxu0 }
 0x104   :  { %v280_v5 = vpop.f32.mrf.mxu1 }
 0x105   :  { %v281_v6 = vadd.f32 %v280_v5, %v209_v4  ;;  %v211_v7 = vpop.f32.mrf.mxu0 }
 0x106   :  { %v282_v8 = vpop.f32.mrf.mxu1 }
 0x107   :  { %285 = vst [vmem:[%s710_s2] sm:$0xff] %v281_v6  ;;  %v283_v9 = vadd.f32 %v282_v8, %v211_v7 }
 0x109   :  { %286 = vst [vmem:[%s710_s2 + $0x8] sm:$0xff] %v283_v9 }

</bundles_post_ra>
